<compile_context>
chip_gen: v7x
topology: tpu7x:2x2x1
jax: 0.10.0
libtpu: 0.0.40
codegen_flags: <defaults>
</compile_context>

<pallas_src>
import math

import jax
import jax.numpy as jnp
from jax.experimental import pallas as pl
from jax.experimental.pallas import tpu as pltpu


def _round_up(x, m):
    return ((x + m - 1) // m) * m


def mlp_kernel(x_ref, w1_ref, b1_ref, w2_ref, b2_ref, w3_ref, b3_ref, o_ref):
    # x tile: (tb, n_in) f32 -> bf16 in-register (no wrapper-side cast pass).
    x = x_ref[...].astype(jnp.bfloat16)
    # Layer 1: bf16 matmul, f32 accumulate, f32 bias + relu.
    h1 = jnp.dot(x, w1_ref[...], preferred_element_type=jnp.float32)
    h1 = jnp.maximum(h1 + b1_ref[...], 0.0)
    # Layer 2
    h2 = jnp.dot(h1.astype(jnp.bfloat16), w2_ref[...],
                 preferred_element_type=jnp.float32)
    h2 = jnp.maximum(h2 + b2_ref[...], 0.0)
    # Layer 3 (no activation); lane-dense 128-wide store.
    out = jnp.dot(h2.astype(jnp.bfloat16), w3_ref[...],
                  preferred_element_type=jnp.float32)
    o_ref[...] = (out + b3_ref[...]).astype(o_ref.dtype)


def pad_params(params):
    """Pad weights/biases ONCE.

    Weights are stored pre-transposed as (in, out) and cast to bf16.  Only the
    hidden and output dims are padded to 128 lanes (they are VMEM-resident and
    tiny); the streamed input feature dim stays unpadded.  Zero padding keeps
    the math identical (padded columns stay 0 through relu; padded output
    columns are sliced off).  Biases stay f32, shaped (1, C) for broadcasting.
    """
    w1, b1, w2, b2, w3, b3 = params
    n_in, n_mid = w1.shape
    n_out = w3.shape[1]
    mid_p = _round_up(n_mid, 128)
    out_p = _round_up(n_out, 128)

    def pad_w(w, r, c):
        full = jnp.zeros((r, c), jnp.float32).at[: w.shape[0], : w.shape[1]].set(w)
        return full.astype(jnp.bfloat16)

    def pad_b(b, c):
        return jnp.zeros((1, c), jnp.float32).at[0, : b.shape[-1]].set(b.reshape(-1))

    padded = (pad_w(w1, n_in, mid_p), pad_b(b1, mid_p),
              pad_w(w2, mid_p, mid_p), pad_b(b2, mid_p),
              pad_w(w3, mid_p, out_p), pad_b(b3, out_p))
    return padded, (n_in, n_mid, n_out)


def net_forward(x, padded_params, dims, *, tile_b=1024):
    """Forward pass of the 3-layer MLP.  x: (B, n_in) float32."""
    n_in, n_mid, n_out = dims
    w1, b1, w2, b2, w3, b3 = padded_params
    out_p = w3.shape[1]

    B = x.shape[0]
    # Large batches: big tiles (amortize per-grid-step overhead, sweep
    # tile_b=512/1024/2048).  Small batches: one 8-row-aligned tile.
    tb = tile_b if B >= tile_b else _round_up(max(B, 1), 8)
    B_p = _round_up(B, tb)

    # Pad only batch rows, only when needed, and only over the narrow n_in
    # feature dim.  When B divides tb, x goes straight into pallas_call with
    # zero extra HBM passes.
    x_in = x if B_p == B else jnp.zeros((B_p, n_in), x.dtype).at[:B].set(x)

    resident = lambda a: pl.BlockSpec(a.shape, lambda i: (0, 0))

    out_full = pl.pallas_call(
        mlp_kernel,
        out_shape=jax.ShapeDtypeStruct((B_p, out_p), jnp.float32),
        grid=(B_p // tb,),
        in_specs=[
            # x: batch-tiled; last block dim == full array dim (no 128 pad).
            pl.BlockSpec((tb, n_in), lambda i: (i, 0)),
            resident(w1), resident(b1),     # weights/biases stay VMEM-resident
            resident(w2), resident(b2),     # across all grid steps
            resident(w3), resident(b3),
        ],
        out_specs=pl.BlockSpec((tb, out_p), lambda i: (i, 0)),
        compiler_params=pltpu.CompilerParams(
            dimension_semantics=("parallel",),   # shard batch tiles across TCs
        ),
    )(x_in, w1, b1, w2, b2, w3, b3)

    return out_full[:B, :n_out]


def init_linear(key, n_in, n_out):
    """PyTorch-style Linear init: U(-1/sqrt(n_in), 1/sqrt(n_in)); W stored (in, out)."""
    kw, kb = jax.random.split(key)
    bound = 1.0 / math.sqrt(n_in)
    w = jax.random.uniform(kw, (n_in, n_out), jnp.float32, -bound, bound)
    b = jax.random.uniform(kb, (n_out,), jnp.float32, -bound, bound)
    return w, b


def _reference(x, params, cast=None):
    """Pure-JAX reference.  cast=jnp.bfloat16 mirrors the kernel's quantization
    (bf16 operands, f32 accumulation) for a tight numerical check."""
    w1, b1, w2, b2, w3, b3 = params
    c = (lambda a: a) if cast is None else (lambda a: a.astype(cast).astype(jnp.float32))
    h1 = jnp.maximum(c(x) @ c(w1) + b1[None, :], 0.0)
    h2 = jnp.maximum(c(h1) @ c(w2) + b2[None, :], 0.0)
    return c(h2) @ c(w3) + b3[None, :]


if __name__ == "__main__":
    # Shapes implied by the DDQN MLP: small state/action dims, hidden = 32.
    B, n_in, n_mid, n_out = 8, 4, 32, 2

    key = jax.random.PRNGKey(0)
    kx, k1, k2, k3, kx2, kx3 = jax.random.split(key, 6)

    x = jax.random.normal(kx, (B, n_in), jnp.float32)
    w1, b1 = init_linear(k1, n_in, n_mid)
    w2, b2 = init_linear(k2, n_mid, n_mid)
    w3, b3 = init_linear(k3, n_mid, n_out)
    params = (w1, b1, w2, b2, w3, b3)

    padded_params, dims = pad_params(params)   # one-time padding, reused per call

    fwd = jax.jit(lambda xb: net_forward(xb, padded_params, dims))
    fwd128 = jax.jit(lambda xb: net_forward(xb, padded_params, dims, tile_b=128))

    def check(out, xin, atol_f32=1e-1):
        ref_bf16 = _reference(xin, params, cast=jnp.bfloat16)   # kernel-mirrored
        ref_f32 = _reference(xin, params)                       # PyTorch semantics
        assert out.shape == (xin.shape[0], n_out)
        assert jnp.allclose(out, ref_bf16, atol=2e-3, rtol=2e-3)
        assert jnp.allclose(out, ref_f32, atol=atol_f32, rtol=atol_f32)

    # Small-batch case: single 8-row tile, x passed in with zero padding work.
    out = jax.block_until_ready(fwd(x))
    check(out, x)

    # Larger batch: single 256-row tile (still below the default 1024-row tile).
    xb = jax.random.normal(kx2, (256, n_in), jnp.float32)
    out_b = jax.block_until_ready(fwd(xb))
    check(out_b, xb)

    # Ragged batch with explicit 128-row tiles: exercises the multi-tile
    # "parallel" grid (3 steps) and the rows-only padding path.
    xc = jax.random.normal(kx3, (300, n_in), jnp.float32)
    out_c = jax.block_until_ready(fwd128(xc))
    check(out_c, xc)

    # TODO(synk): for the act()/argmax path, a fused in-kernel argmax over the
    # n_out real columns would remove the padded output store entirely.
    print("KERNEL_OK")
</pallas_src>

<mosaic_0001>
module attributes {stable_mosaic.version = 11 : i64} {
  func.func @mlp_kernel(%arg0: i32, %arg1: memref<8x4xf32, #tpu.memory_space<vmem>>, %arg2: memref<4x128xbf16, #tpu.memory_space<vmem>>, %arg3: memref<1x128xf32, #tpu.memory_space<vmem>>, %arg4: memref<128x128xbf16, #tpu.memory_space<vmem>>, %arg5: memref<1x128xf32, #tpu.memory_space<vmem>>, %arg6: memref<128x128xbf16, #tpu.memory_space<vmem>>, %arg7: memref<1x128xf32, #tpu.memory_space<vmem>>, %arg8: memref<8x128xf32, #tpu.memory_space<vmem>>) attributes {dimension_semantics = [#tpu.dimension_semantics<parallel>], iteration_bounds = array<i64: 1>, scalar_prefetch = 0 : i64, scratch_operands = 0 : i64, tpu.core_type = #tpu.core_type<tc>, window_params = [{transform_indices = @transform_0, window_bounds = array<i64: 8, 4>}, {pipeline_mode = #tpu.pipeline_mode<synchronous>, transform_indices = @transform_1, window_bounds = array<i64: 4, 128>}, {pipeline_mode = #tpu.pipeline_mode<synchronous>, transform_indices = @transform_2, window_bounds = array<i64: 1, 128>}, {pipeline_mode = #tpu.pipeline_mode<synchronous>, transform_indices = @transform_3, window_bounds = array<i64: 128, 128>}, {pipeline_mode = #tpu.pipeline_mode<synchronous>, transform_indices = @transform_4, window_bounds = array<i64: 1, 128>}, {pipeline_mode = #tpu.pipeline_mode<synchronous>, transform_indices = @transform_5, window_bounds = array<i64: 128, 128>}, {pipeline_mode = #tpu.pipeline_mode<synchronous>, transform_indices = @transform_6, window_bounds = array<i64: 1, 128>}, {transform_indices = @transform_7, window_bounds = array<i64: 8, 128>}]} {
    %c0 = arith.constant 0 : index
    %c0_0 = arith.constant 0 : index
    %0 = vector.load %arg1[%c0, %c0_0] : memref<8x4xf32, #tpu.memory_space<vmem>>, vector<8x4xf32>
    %1 = arith.truncf %0 : vector<8x4xf32> to vector<8x4xbf16>
    %c0_1 = arith.constant 0 : index
    %c0_2 = arith.constant 0 : index
    %2 = vector.load %arg2[%c0_1, %c0_2] : memref<4x128xbf16, #tpu.memory_space<vmem>>, vector<4x128xbf16>
    %cst = arith.constant dense<0.000000e+00> : vector<8x128xf32>
    %3 = tpu.matmul %1, %2, %cst {dimension_numbers = #tpu.dot_dimension_numbers<[1], [0], [0], [1], [0, 0, 1, 1], [], []>} : vector<8x4xbf16>, vector<4x128xbf16>, vector<8x128xf32> -> vector<8x128xf32>
    %c0_3 = arith.constant 0 : index
    %c0_4 = arith.constant 0 : index
    %4 = vector.load %arg3[%c0_3, %c0_4] : memref<1x128xf32, #tpu.memory_space<vmem>>, vector<1x128xf32>
    %5 = vector.broadcast %4 : vector<1x128xf32> to vector<8x128xf32>
    %6 = arith.addf %3, %5 : vector<8x128xf32>
    %cst_5 = arith.constant 0.000000e+00 : f32
    %7 = vector.broadcast %cst_5 : f32 to vector<8x128xf32>
    %8 = arith.maximumf %6, %7 : vector<8x128xf32>
    %9 = arith.truncf %8 : vector<8x128xf32> to vector<8x128xbf16>
    %c0_6 = arith.constant 0 : index
    %c0_7 = arith.constant 0 : index
    %10 = vector.load %arg4[%c0_6, %c0_7] : memref<128x128xbf16, #tpu.memory_space<vmem>>, vector<128x128xbf16>
    %cst_8 = arith.constant dense<0.000000e+00> : vector<8x128xf32>
    %11 = tpu.matmul %9, %10, %cst_8 {dimension_numbers = #tpu.dot_dimension_numbers<[1], [0], [0], [1], [0, 0, 1, 1], [], []>} : vector<8x128xbf16>, vector<128x128xbf16>, vector<8x128xf32> -> vector<8x128xf32>
    %c0_9 = arith.constant 0 : index
    %c0_10 = arith.constant 0 : index
    %12 = vector.load %arg5[%c0_9, %c0_10] : memref<1x128xf32, #tpu.memory_space<vmem>>, vector<1x128xf32>
    %13 = vector.broadcast %12 : vector<1x128xf32> to vector<8x128xf32>
    %14 = arith.addf %11, %13 : vector<8x128xf32>
    %cst_11 = arith.constant 0.000000e+00 : f32
    %15 = vector.broadcast %cst_11 : f32 to vector<8x128xf32>
    %16 = arith.maximumf %14, %15 : vector<8x128xf32>
    %17 = arith.truncf %16 : vector<8x128xf32> to vector<8x128xbf16>
    %c0_12 = arith.constant 0 : index
    %c0_13 = arith.constant 0 : index
    %18 = vector.load %arg6[%c0_12, %c0_13] : memref<128x128xbf16, #tpu.memory_space<vmem>>, vector<128x128xbf16>
    %cst_14 = arith.constant dense<0.000000e+00> : vector<8x128xf32>
    %19 = tpu.matmul %17, %18, %cst_14 {dimension_numbers = #tpu.dot_dimension_numbers<[1], [0], [0], [1], [0, 0, 1, 1], [], []>} : vector<8x128xbf16>, vector<128x128xbf16>, vector<8x128xf32> -> vector<8x128xf32>
    %c0_15 = arith.constant 0 : index
    %c0_16 = arith.constant 0 : index
    %20 = vector.load %arg7[%c0_15, %c0_16] : memref<1x128xf32, #tpu.memory_space<vmem>>, vector<1x128xf32>
    %21 = vector.broadcast %20 : vector<1x128xf32> to vector<8x128xf32>
    %22 = arith.addf %19, %21 : vector<8x128xf32>
    %c0_17 = arith.constant 0 : index
    %c0_18 = arith.constant 0 : index
    %23 = vector.load %arg8[%c0_17, %c0_18] : memref<8x128xf32, #tpu.memory_space<vmem>>, vector<8x128xf32>
    tpu.vector_store %arg8[%c0_17, %c0_18], %22 {strides = array<i32>} : memref<8x128xf32, #tpu.memory_space<vmem>>, vector<8x128xf32>,
    return
  }
  func.func @transform_0(%arg0: i32) -> (i32, i32) {
    %c0_i32 = arith.constant 0 : i32
    %c0_i32_0 = arith.constant 0 : i32
    return %arg0, %c0_i32 : i32, i32
  }
  func.func @transform_1(%arg0: i32) -> (i32, i32) {
    %c0_i32 = arith.constant 0 : i32
    %c0_i32_0 = arith.constant 0 : i32
    %c0_i32_1 = arith.constant 0 : i32
    return %c0_i32, %c0_i32_0 : i32, i32
  }
  func.func @transform_2(%arg0: i32) -> (i32, i32) {
    %c0_i32 = arith.constant 0 : i32
    %c0_i32_0 = arith.constant 0 : i32
    %c0_i32_1 = arith.constant 0 : i32
    return %c0_i32, %c0_i32_0 : i32, i32
  }
  func.func @transform_3(%arg0: i32) -> (i32, i32) {
    %c0_i32 = arith.constant 0 : i32
    %c0_i32_0 = arith.constant 0 : i32
    %c0_i32_1 = arith.constant 0 : i32
    return %c0_i32, %c0_i32_0 : i32, i32
  }
  func.func @transform_4(%arg0: i32) -> (i32, i32) {
    %c0_i32 = arith.constant 0 : i32
    %c0_i32_0 = arith.constant 0 : i32
    %c0_i32_1 = arith.constant 0 : i32
    return %c0_i32, %c0_i32_0 : i32, i32
  }
  func.func @transform_5(%arg0: i32) -> (i32, i32) {
    %c0_i32 = arith.constant 0 : i32
    %c0_i32_0 = arith.constant 0 : i32
    %c0_i32_1 = arith.constant 0 : i32
    return %c0_i32, %c0_i32_0 : i32, i32
  }
  func.func @transform_6(%arg0: i32) -> (i32, i32) {
    %c0_i32 = arith.constant 0 : i32
    %c0_i32_0 = arith.constant 0 : i32
    %c0_i32_1 = arith.constant 0 : i32
    return %c0_i32, %c0_i32_0 : i32, i32
  }
  func.func @transform_7(%arg0: i32) -> (i32, i32) {
    %c0_i32 = arith.constant 0 : i32
    %c0_i32_0 = arith.constant 0 : i32
    return %arg0, %c0_i32 : i32, i32
  }
}

</mosaic_0001>

<bundles_post_ra>
// kernel: _lambda_.1
= control target key start
LH: loop header
LB: loop body
LE: loop exit
PB: predicated region body
PF: predicated region fallthrough
CT: control target
= control target key end

     0   :  { %12 = vsyncpa [#allocation3], 0  ;;  %s613_s0 = inlined_call_operand.vmem [shape: f32[8,4], index: 0, kind: input, shape index: {}]   ;;  %s614_s1 = inlined_call_operand.vmem [shape: bf16[4,128], index: 1, kind: input, shape index: {}]   ;;  %s615_s2 = inlined_call_operand.vmem [shape: f32[1,128], index: 2, kind: input, shape index: {}]   ;;  %s616_s3 = inlined_call_operand.hbm [shape: bf16[128,128], index: 3, kind: input, shape index: {}]   ;;  %s617_s4 = inlined_call_operand.vmem [shape: f32[1,128], index: 4, kind: input, shape index: {}]   ;;  %s618_s5 = inlined_call_operand.hbm [shape: bf16[128,128], index: 5, kind: input, shape index: {}]   ;;  %s619_s6 = inlined_call_operand.vmem [shape: f32[1,128], index: 6, kind: input, shape index: {}]   ;;  %s620_s7 = inlined_call_operand.vmem [shape: f32[8,128], index: 7, kind: output, shape index: {}]  }
   0x1   :  { %13 = vsyncpa [#allocation5], 0  ;;  %s502_s24 = smov [#allocation2]   ;;  %s454_s28 = scalar_lea.hbm %s616_s3, 1024 }
   0x2   :  { %s25_s25 = sshll.u32 %s502_s24, 4  ;;  %p455_p0 = scmp.ne.s32.totalorder %s616_s3, %s454_s28  ;;  %s26_s25 = int_to_ptr.vmem [resolvable:$true] %s25_s25 }
   0x3   :  { %p458_p1 = scmp.lt.u32.totalorder %s454_s28, %s616_s3 }
   0x5   :  { %p460_p2 = pnand %p458_p1, %p455_p0 }
   0x7   :  { %463 = shalt.err (!%p460_p2)
}
   0x8   :  { %s464_s10 = scalar_lea.vmem %s26_s25, 1024  ;;  %p469_p4 = scmp.lt.s32.totalorder %s26_s25, %s26_s25 }
   0x9   :  { %p465_p3 = scmp.ne.s32.totalorder %s26_s25, %s464_s10  ;;  %p470_p5 = scmp.lt.s32.totalorder %s464_s10, %s464_s10 }
   0xb   :  { %p471_p6 = por %p470_p5, %p469_p4 }
   0xd   :  { %p472_p7 = pnand %p471_p6, %p465_p3 }
   0xf   :  { %475 = shalt.err (!%p472_p7)
}
  0x10   :  { %s503_s11 = smov 64   ;;  %s504_s12 = smov 4  }
  0x11   :  { %31 = dma.hbm_to_vmem [thread:$0]  %s616_s3, 1024, %s26_s25, [#allocation3], %s503_s11, %s503_s11, %s504_s12  }
  0x12   :  { %s505_s15 = smov [#allocation4]   ;;  %s476_s19 = scalar_lea.hbm %s618_s5, 1024 }
  0x13   :  { %s39_s16 = sshll.u32 %s505_s15, 4  ;;  %p477_p8 = scmp.ne.s32.totalorder %s618_s5, %s476_s19  ;;  %s40_s16 = int_to_ptr.vmem [resolvable:$true] %s39_s16 }
  0x14   :  { %p480_p9 = scmp.lt.u32.totalorder %s476_s19, %s618_s5 }
  0x16   :  { %p482_p10 = pnand %p480_p9, %p477_p8 }
  0x18   :  { %485 = shalt.err (!%p482_p10)
}
  0x19   :  { %s486_s24 = scalar_lea.vmem %s40_s16, 1024  ;;  %p491_p12 = scmp.lt.s32.totalorder %s40_s16, %s40_s16 }
  0x1a   :  { %p487_p11 = scmp.ne.s32.totalorder %s40_s16, %s486_s24  ;;  %p492_p13 = scmp.lt.s32.totalorder %s486_s24, %s486_s24 }
  0x1c   :  { %p493_p0 = por %p492_p13, %p491_p12 }
  0x1e   :  { %p494_p1 = pnand %p493_p0, %p487_p11 }
  0x20   :  { %497 = shalt.err (!%p494_p1)
}
  0x21   :  { %45 = dma.hbm_to_vmem [thread:$0]  %s618_s5, 1024, %s40_s16, [#allocation5], %s503_s11, %s503_s11, %s504_s12  }
  0x22   :  { %498 = dma.done.wait [#allocation3], 1024  }
  0x23   :  { %499 = vsyncadd [#allocation3], 4294966272 }
  0x24   :  { %500 = dma.done.wait [#allocation5], 1024  }
  0x25   :  { %501 = vsyncadd [#allocation5], 4294966272  ;;  %v506_v0 = vmov 0.0   ;;  %vm507_vm0 = vmmov 0   ;;  %vm69_vm1 = vcmask 1041408   ;;  %v55_v2 = vld [vmem:[%s613_s0] sm:$0xff] }
  0x26   :  { %386 = vmatprep.subr.bf16.mxu0 %v506_v0  ;;  %388 = vmatprep.mubr.msk.bf16.mxu0 %vm507_vm0, %v506_v0  ;;  %v57_v1 = vld [vmem:[%s614_s1] sm:$0x3]  ;;  %v56_v4 = vpack.c.bf16 %v55_v2, %v55_v2  ;;  %vm65_vm2 = vcmask 31744   ;;  %v439_v6 = vld [vmem:[#allocation2 + $0x8] sm:$0xff]   ;;  %v440_v7 = vld [vmem:[#allocation2 + $0x10] sm:$0xff]  }
  0x27   :  { %392 = vmatprep.subr.bf16.mxu1 %v506_v0  ;;  %408 = vmatprep.mubr.msk.bf16.mxu1 %vm507_vm0, %v506_v0  ;;  %v71_v3 = vsel %vm69_vm1, %v57_v1, 0  ;;  %v438_v5 = vld [vmem:[#allocation2] sm:$0xff]   ;;  %v441_v8 = vld [vmem:[#allocation2 + $0x18] sm:$0xff]   ;;  %v443_v10 = vld [vmem:[#allocation2 + $0x28] sm:$0xff]  }
  0x28   :  { %387 = vmatpush3.bf16.msra.mxu0 %v71_v3  ;;  %393 = vmatpush3.bf16.msra.mxu1 %v438_v5  ;;  %v442_v9 = vld [vmem:[#allocation2 + $0x20] sm:$0xff]   ;;  %v444_v11 = vld [vmem:[#allocation2 + $0x30] sm:$0xff]   ;;  %v445_v12 = vld [vmem:[#allocation2 + $0x38] sm:$0xff]  }
  0x29   :  { %412 = vmatprep.subr.bf16.mxu0 %v506_v0  ;;  %394 = vmatprep.subr.bf16.mxu1 %v506_v0  ;;  %v446_v13 = vld [vmem:[#allocation4] sm:$0xff]   ;;  %v447_v14 = vld [vmem:[#allocation4 + $0x8] sm:$0xff]   ;;  %v448_v15 = vld [vmem:[#allocation4 + $0x10] sm:$0xff]  }
  0x2a   :  { %v449_v16 = vld [vmem:[#allocation4 + $0x18] sm:$0xff]   ;;  %v450_v17 = vld [vmem:[#allocation4 + $0x20] sm:$0xff]   ;;  %v451_v18 = vld [vmem:[#allocation4 + $0x28] sm:$0xff]  }
  0x2b   :  { %389 = vmatmul.mubr.msk.bf16.vlgmr.msra.gmra.mrb[0].mxu0 %vm65_vm2, %v56_v4  ;;  %v346_v19 = vld [vmem:[%s615_s2] ss:$0 sm:$0xff]  ;;  %v452_v27 = vld [vmem:[#allocation4 + $0x30] sm:$0xff]   ;;  %v453_v28 = vld [vmem:[#allocation4 + $0x38] sm:$0xff]  }
  0x2c   :  { %428 = vmatprep.mubr.msk.bf16.mxu0 %vm507_vm0, %v506_v0  ;;  %395 = vmatpush3.bf16.msra.mxu1 %v439_v6  ;;  %v348_v29 = vld [vmem:[%s617_s4] ss:$0 sm:$0xff] }
  0x2d   :  { %396 = vmatprep.subr.bf16.mxu1 %v506_v0  ;;  %413 = vmatpush3.bf16.msra.mxu0 %v446_v13  ;;  %v357_v37 = vld [vmem:[%s619_s6] ss:$0 sm:$0xff] }
  0x2e   :  { %414 = vmatprep.subr.bf16.mxu0 %v506_v0 }
  0x30   :  { %397 = vmatpush3.bf16.msra.mxu1 %v440_v7 }
  0x31   :  { %398 = vmatprep.subr.bf16.mxu1 %v506_v0  ;;  %415 = vmatpush3.bf16.msra.mxu0 %v447_v14 }
  0x32   :  { %416 = vmatprep.subr.bf16.mxu0 %v506_v0 }
  0x34   :  { %399 = vmatpush3.bf16.msra.mxu1 %v441_v8 }
  0x35   :  { %400 = vmatprep.subr.bf16.mxu1 %v506_v0  ;;  %417 = vmatpush3.bf16.msra.mxu0 %v448_v15 }
  0x36   :  { %418 = vmatprep.subr.bf16.mxu0 %v506_v0 }
  0x38   :  { %401 = vmatpush3.bf16.msra.mxu1 %v442_v9 }
  0x39   :  { %402 = vmatprep.subr.bf16.mxu1 %v506_v0  ;;  %419 = vmatpush3.bf16.msra.mxu0 %v449_v16 }
  0x3a   :  { %420 = vmatprep.subr.bf16.mxu0 %v506_v0 }
  0x3c   :  { %403 = vmatpush3.bf16.msra.mxu1 %v443_v10 }
  0x3d   :  { %404 = vmatprep.subr.bf16.mxu1 %v506_v0  ;;  %421 = vmatpush3.bf16.msra.mxu0 %v450_v17 }
  0x3e   :  { %422 = vmatprep.subr.bf16.mxu0 %v506_v0 }
  0x40   :  { %405 = vmatpush3.bf16.msra.mxu1 %v444_v11 }
  0x41   :  { %406 = vmatprep.subr.bf16.mxu1 %v506_v0  ;;  %423 = vmatpush3.bf16.msra.mxu0 %v451_v18 }
  0x42   :  { %424 = vmatprep.subr.bf16.mxu0 %v506_v0 }
  0x44   :  { %407 = vmatpush3.bf16.msra.mxu1 %v445_v12 }
  0x45   :  { %425 = vmatpush3.bf16.msra.mxu0 %v452_v27 }
  0x46   :  { %426 = vmatprep.subr.bf16.mxu0 %v506_v0 }
  0x49   :  { %427 = vmatpush3.bf16.msra.mxu0 %v453_v28 }
  0xfe   :  { %v107_v20 = vpop.f32.mrb[0].mxu0 }
  0xff   :  { %v108_v21 = vadd.f32 %v346_v19, %v107_v20  ;;  %v390_v22 = vpop.f32.mrb[1].mxu0 }
 0x100   :  { %v110_v23 = vpop.f32.mrb[2].mxu0 }
 0x101   :  { %v113_v24 = vmax.f32 %v108_v21, 0.0  ;;  %v391_v25 = vpop.f32.mrb[3].mxu0 }
 0x103   :  { %v114_v26 = vpack.c.bf16 %v113_v24, %v113_v24 }
 0x105   :  { %409 = vmatmul.mubr.bf16.vlgmr.msra.gmra.mrb[0].mxu1 %v114_v26 }
 0x1d8   :  { %v220_v30 = vpop.f32.mrb[0].mxu1 }
 0x1d9   :  { %v221_v31 = vadd.f32 %v348_v29, %v220_v30  ;;  %v410_v32 = vpop.f32.mrb[1].mxu1 }
 0x1da   :  { %v223_v33 = vpop.f32.mrb[2].mxu1 }
 0x1db   :  { %v226_v34 = vmax.f32 %v221_v31, 0.0  ;;  %v411_v35 = vpop.f32.mrb[3].mxu1 }
 0x1dd   :  { %v227_v36 = vpack.c.bf16 %v226_v34, %v226_v34 }
 0x1df   :  { %429 = vmatmul.mubr.bf16.vlgmr.msra.gmra.mrb[4].mxu0 %v227_v36 }
 0x2b2   :  { %v333_v38 = vpop.f32.mrb[4].mxu0 }
 0x2b3   :  { %v334_v39 = vadd.f32 %v357_v37, %v333_v38  ;;  %v430_v40 = vpop.f32.mrb[5].mxu0 }
 0x2b4   :  { %v336_v41 = vpop.f32.mrb[6].mxu0 }
 0x2b5   :  { %339 = vst [vmem:[%s620_s7] sm:$0xff] %v334_v39  ;;  %v431_v42 = vpop.f32.mrb[7].mxu0 }
 0x2b6   :  { %344 = vsyncpa [#allocation3], 1 }
 0x2b7   :  { %345 = vsyncpa [#allocation5], 1 }

</bundles_post_ra>
